<compile_context>
chip_gen: v6e
topology: v6e:2x2x1
jax: 0.10.0
libtpu: 0.0.40
codegen_flags: <defaults>
</compile_context>

<pallas_src>
import functools
import numpy as np
import jax
import jax.numpy as jnp
from jax.experimental import pallas as pl
from jax.experimental.pallas import tpu as pltpu


def _round_up(x, m):
    return (x + m - 1) // m * m


def _policy_kernel(x_ref, w_enc_ref, b_enc_ref, w_out_ref, b_out_ref,
                   logits_ref, acc_ref):
    """grid = (batch_tiles, k_tiles); k (contraction over obs_dim) is the last axis."""
    k = pl.program_id(1)

    @pl.when(k == 0)
    def _():
        acc_ref[...] = jnp.zeros_like(acc_ref)

    # encoder partial sum: acc += x_tile @ W_enc_tile   (bf16 in, f32 accumulate)
    acc_ref[...] += jnp.dot(x_ref[...], w_enc_ref[...],
                            preferred_element_type=jnp.float32)

    @pl.when(k == pl.num_programs(1) - 1)
    def _():
        hidden = acc_ref[...] + b_enc_ref[...]                      # f32 bias add
        # fused decoders + value head: logits = hidden @ W_out + b_out
        logits_ref[...] = (
            jnp.dot(hidden.astype(w_out_ref.dtype), w_out_ref[...],
                    preferred_element_type=jnp.float32)
            + b_out_ref[...]
        ).astype(logits_ref.dtype)


@functools.partial(jax.jit, static_argnames=("nvec",))
def policy_forward(env_outputs, w_enc, b_enc, w_out, b_out, *, nvec):
    """env_outputs: (B, *obs_shape). Returns (list_of_action_logits, value)."""
    B = env_outputs.shape[0]
    x = env_outputs.reshape(B, -1)
    D = x.shape[1]
    H = w_enc.shape[1]                 # 128
    O = w_out.shape[1]                 # sum(nvec) + 1

    # ---- tile selection (sublane/lane aligned; batch tile capped at 256) ----
    TILE_B = min(256, _round_up(B, 8))
    TILE_K = min(1024, _round_up(D, 128))
    B_pad = _round_up(B, TILE_B)
    D_pad = _round_up(D, TILE_K)
    O_pad = _round_up(O, 128)          # lane-dense output store

    # ---- bf16 inputs/weights (f32 accumulate in-kernel), zero-pad to tile grid ----
    x_p = x.astype(jnp.bfloat16)
    if (B_pad, D_pad) != (B, D):
        x_p = jnp.pad(x_p, ((0, B_pad - B), (0, D_pad - D)))
    w_enc_p = w_enc.astype(jnp.bfloat16)
    if D_pad != D:
        w_enc_p = jnp.pad(w_enc_p, ((0, D_pad - D), (0, 0)))
    w_out_p = w_out.astype(jnp.bfloat16)
    b_out_p = b_out.astype(jnp.float32)
    if O_pad != O:
        w_out_p = jnp.pad(w_out_p, ((0, 0), (0, O_pad - O)))
        b_out_p = jnp.pad(b_out_p, ((0, O_pad - O),))
    b_enc2 = b_enc.reshape(1, H).astype(jnp.float32)
    b_out2 = b_out_p.reshape(1, O_pad)

    grid = (B_pad // TILE_B, D_pad // TILE_K)

    cost = pl.CostEstimate(
        flops=2 * B_pad * D_pad * H + 2 * B_pad * H * O_pad,
        transcendentals=0,
        bytes_accessed=(B_pad * D_pad * 2 + D_pad * H * 2 + H * O_pad * 2
                        + B_pad * O_pad * 4 + (H + O_pad) * 4),
    )

    logits = pl.pallas_call(
        _policy_kernel,
        out_shape=jax.ShapeDtypeStruct((B_pad, O_pad), jnp.float32),
        grid=grid,
        in_specs=[
            pl.BlockSpec((TILE_B, TILE_K), lambda i, k: (i, k)),   # x tile
            pl.BlockSpec((TILE_K, H),      lambda i, k: (k, 0)),   # W_enc K-slab
            pl.BlockSpec((1, H),           lambda i, k: (0, 0)),   # b_enc (resident)
            pl.BlockSpec((H, O_pad),       lambda i, k: (0, 0)),   # fused head W (resident)
            pl.BlockSpec((1, O_pad),       lambda i, k: (0, 0)),   # fused head b (resident)
        ],
        out_specs=pl.BlockSpec((TILE_B, O_pad), lambda i, k: (i, 0)),
        scratch_shapes=[pltpu.VMEM((TILE_B, H), jnp.float32)],     # hidden accumulator
        compiler_params=pltpu.CompilerParams(
            dimension_semantics=("parallel", "arbitrary"),
            vmem_limit_bytes=32 * 1024 * 1024,                     # safe on v5e/v6e/v7x
        ),
        cost_estimate=cost,
    )(x_p, w_enc_p, b_enc2, w_out_p, b_out2)

    # drop batch / output padding, split per-decoder logits and the value column
    logits = logits[:B]
    actions = []
    off = 0
    for n in nvec:
        actions.append(logits[:, off:off + n])
        off += n
    value = logits[:, off:off + 1]
    return actions, value


def init_params(key, obs_dim, hidden_dim, nvec):
    """Deterministic nn.Linear-style init (uniform +-1/sqrt(fan_in)),
    weights stored pre-transposed as (in, out)."""
    keys = jax.random.split(key, 4)
    lim_enc = 1.0 / np.sqrt(obs_dim)
    w_enc = jax.random.uniform(keys[0], (obs_dim, hidden_dim), jnp.float32,
                               -lim_enc, lim_enc)
    b_enc = jax.random.uniform(keys[1], (hidden_dim,), jnp.float32,
                               -lim_enc, lim_enc)

    lim_dec = 1.0 / np.sqrt(hidden_dim)
    total_out = int(sum(nvec)) + 1      # all decoder heads + value head, fused
    w_out = jax.random.uniform(keys[2], (hidden_dim, total_out), jnp.float32,
                               -lim_dec, lim_dec)
    b_out = jax.random.uniform(keys[3], (total_out,), jnp.float32,
                               -lim_dec, lim_dec)
    return w_enc, b_enc, w_out, b_out


def reference_forward(env_outputs, w_enc, b_enc, w_out, b_out, nvec):
    """Pure-JAX f32 reference matching the PyTorch module."""
    x = env_outputs.reshape(env_outputs.shape[0], -1).astype(jnp.float32)
    hidden = x @ w_enc + b_enc
    logits = hidden @ w_out + b_out
    actions, off = [], 0
    for n in nvec:
        actions.append(logits[:, off:off + n]); off += n
    value = logits[:, off:off + 1]
    return actions, value


if __name__ == "__main__":
    key = jax.random.PRNGKey(0)
    k_obs, k_par = jax.random.split(key)

    # small shapes consistent with the module: batched flat observations,
    # multi-discrete action space (nvec), hidden=128 (as in the module).
    B = 8
    obs_shape = (4, 16, 16)                 # flattened obs_dim = 1024
    obs_dim = int(np.prod(obs_shape))
    hidden_dim = 128
    nvec = (6, 5, 4, 3)                     # synthetic MultiDiscrete nvec

    env_outputs = jax.random.normal(k_obs, (B,) + obs_shape, jnp.float32)
    w_enc, b_enc, w_out, b_out = init_params(k_par, obs_dim, hidden_dim, nvec)

    actions, value = policy_forward(env_outputs, w_enc, b_enc, w_out, b_out,
                                    nvec=nvec)
    jax.block_until_ready(actions)
    jax.block_until_ready(value)

    # correctness check against a pure-JAX f32 reference
    # (tolerance loosened for bf16 MXU inputs with f32 accumulation)
    ref_actions, ref_value = reference_forward(env_outputs, w_enc, b_enc,
                                               w_out, b_out, nvec)
    for a, ra, n in zip(actions, ref_actions, nvec):
        assert a.shape == (B, n), a.shape
        np.testing.assert_allclose(np.asarray(a), np.asarray(ra),
                                   rtol=2e-2, atol=2e-2)
    assert value.shape == (B, 1), value.shape
    np.testing.assert_allclose(np.asarray(value), np.asarray(ref_value),
                               rtol=2e-2, atol=2e-2)

    print("KERNEL_OK")
</pallas_src>

<mosaic_0001>
module attributes {stable_mosaic.version = 11 : i64} {
  func.func @_policy_kernel(%arg0: i32, %arg1: i32, %arg2: memref<8x1024xbf16, #tpu.memory_space<vmem>>, %arg3: memref<1024x128xbf16, #tpu.memory_space<vmem>>, %arg4: memref<1x128xf32, #tpu.memory_space<vmem>>, %arg5: memref<128x128xbf16, #tpu.memory_space<vmem>>, %arg6: memref<1x128xf32, #tpu.memory_space<vmem>>, %arg7: memref<8x128xf32, #tpu.memory_space<vmem>>, %arg8: memref<8x128xf32, #tpu.memory_space<vmem>>) attributes {dimension_semantics = [#tpu.dimension_semantics<parallel>, #tpu.dimension_semantics<arbitrary>], iteration_bounds = array<i64: 1, 1>, scalar_prefetch = 0 : i64, scratch_operands = 1 : i64, tpu.core_type = #tpu.core_type<tc>, window_params = [{transform_indices = @transform_0, window_bounds = array<i64: 8, 1024>}, {transform_indices = @transform_1, window_bounds = array<i64: 1024, 128>}, {pipeline_mode = #tpu.pipeline_mode<synchronous>, transform_indices = @transform_2, window_bounds = array<i64: 1, 128>}, {pipeline_mode = #tpu.pipeline_mode<synchronous>, transform_indices = @transform_3, window_bounds = array<i64: 128, 128>}, {pipeline_mode = #tpu.pipeline_mode<synchronous>, transform_indices = @transform_4, window_bounds = array<i64: 1, 128>}, {transform_indices = @transform_5, window_bounds = array<i64: 8, 128>}]} {
    %c0_i32 = arith.constant 0 : i32
    %0 = arith.cmpi eq, %arg1, %c0_i32 : i32
    %1 = arith.extui %0 : i1 to i32
    %c0_i32_0 = arith.constant 0 : i32
    %2 = arith.cmpi ne, %1, %c0_i32_0 : i32
    scf.if %2 {
      %cst_10 = arith.constant 0.000000e+00 : f32
      %12 = vector.broadcast %cst_10 : f32 to vector<8x128xf32>
      %c0_11 = arith.constant 0 : index
      %c0_12 = arith.constant 0 : index
      %13 = vector.load %arg8[%c0_11, %c0_12] : memref<8x128xf32, #tpu.memory_space<vmem>>, vector<8x128xf32>
      tpu.vector_store %arg8[%c0_11, %c0_12], %12 {strides = array<i32>} : memref<8x128xf32, #tpu.memory_space<vmem>>, vector<8x128xf32>,
    } else {
    }
    %c0 = arith.constant 0 : index
    %c0_1 = arith.constant 0 : index
    %3 = vector.load %arg8[%c0, %c0_1] : memref<8x128xf32, #tpu.memory_space<vmem>>, vector<8x128xf32>
    %c0_2 = arith.constant 0 : index
    %c0_3 = arith.constant 0 : index
    %4 = vector.load %arg2[%c0_2, %c0_3] : memref<8x1024xbf16, #tpu.memory_space<vmem>>, vector<8x1024xbf16>
    %c0_4 = arith.constant 0 : index
    %c0_5 = arith.constant 0 : index
    %5 = vector.load %arg3[%c0_4, %c0_5] : memref<1024x128xbf16, #tpu.memory_space<vmem>>, vector<1024x128xbf16>
    %cst = arith.constant dense<0.000000e+00> : vector<8x128xf32>
    %6 = tpu.matmul %4, %5, %cst {dimension_numbers = #tpu.dot_dimension_numbers<[1], [0], [0], [1], [0, 0, 1, 1], [], []>} : vector<8x1024xbf16>, vector<1024x128xbf16>, vector<8x128xf32> -> vector<8x128xf32>
    %7 = arith.addf %3, %6 : vector<8x128xf32>
    %c0_6 = arith.constant 0 : index
    %c0_7 = arith.constant 0 : index
    %8 = vector.load %arg8[%c0_6, %c0_7] : memref<8x128xf32, #tpu.memory_space<vmem>>, vector<8x128xf32>
    tpu.vector_store %arg8[%c0_6, %c0_7], %7 {strides = array<i32>} : memref<8x128xf32, #tpu.memory_space<vmem>>, vector<8x128xf32>,
    %c0_i32_8 = arith.constant 0 : i32
    %9 = arith.cmpi eq, %arg1, %c0_i32_8 : i32
    %10 = arith.extui %9 : i1 to i32
    %c0_i32_9 = arith.constant 0 : i32
    %11 = arith.cmpi ne, %10, %c0_i32_9 : i32
    scf.if %11 {
      %c0_10 = arith.constant 0 : index
      %c0_11 = arith.constant 0 : index
      %12 = vector.load %arg8[%c0_10, %c0_11] : memref<8x128xf32, #tpu.memory_space<vmem>>, vector<8x128xf32>
      %c0_12 = arith.constant 0 : index
      %c0_13 = arith.constant 0 : index
      %13 = vector.load %arg4[%c0_12, %c0_13] : memref<1x128xf32, #tpu.memory_space<vmem>>, vector<1x128xf32>
      %14 = vector.broadcast %13 : vector<1x128xf32> to vector<8x128xf32>
      %15 = arith.addf %12, %14 : vector<8x128xf32>
      %16 = arith.truncf %15 : vector<8x128xf32> to vector<8x128xbf16>
      %c0_14 = arith.constant 0 : index
      %c0_15 = arith.constant 0 : index
      %17 = vector.load %arg5[%c0_14, %c0_15] : memref<128x128xbf16, #tpu.memory_space<vmem>>, vector<128x128xbf16>
      %cst_16 = arith.constant dense<0.000000e+00> : vector<8x128xf32>
      %18 = tpu.matmul %16, %17, %cst_16 {dimension_numbers = #tpu.dot_dimension_numbers<[1], [0], [0], [1], [0, 0, 1, 1], [], []>} : vector<8x128xbf16>, vector<128x128xbf16>, vector<8x128xf32> -> vector<8x128xf32>
      %c0_17 = arith.constant 0 : index
      %c0_18 = arith.constant 0 : index
      %19 = vector.load %arg6[%c0_17, %c0_18] : memref<1x128xf32, #tpu.memory_space<vmem>>, vector<1x128xf32>
      %20 = vector.broadcast %19 : vector<1x128xf32> to vector<8x128xf32>
      %21 = arith.addf %18, %20 : vector<8x128xf32>
      %c0_19 = arith.constant 0 : index
      %c0_20 = arith.constant 0 : index
      %22 = vector.load %arg7[%c0_19, %c0_20] : memref<8x128xf32, #tpu.memory_space<vmem>>, vector<8x128xf32>
      tpu.vector_store %arg7[%c0_19, %c0_20], %21 {strides = array<i32>} : memref<8x128xf32, #tpu.memory_space<vmem>>, vector<8x128xf32>,
    } else {
    }
    return
  }
  func.func @transform_0(%arg0: i32, %arg1: i32) -> (i32, i32) {
    %c0_i32 = arith.constant 0 : i32
    return %arg0, %arg1 : i32, i32
  }
  func.func @transform_1(%arg0: i32, %arg1: i32) -> (i32, i32) {
    %c0_i32 = arith.constant 0 : i32
    %c0_i32_0 = arith.constant 0 : i32
    return %arg1, %c0_i32 : i32, i32
  }
  func.func @transform_2(%arg0: i32, %arg1: i32) -> (i32, i32) {
    %c0_i32 = arith.constant 0 : i32
    %c0_i32_0 = arith.constant 0 : i32
    %c0_i32_1 = arith.constant 0 : i32
    return %c0_i32, %c0_i32_0 : i32, i32
  }
  func.func @transform_3(%arg0: i32, %arg1: i32) -> (i32, i32) {
    %c0_i32 = arith.constant 0 : i32
    %c0_i32_0 = arith.constant 0 : i32
    %c0_i32_1 = arith.constant 0 : i32
    return %c0_i32, %c0_i32_0 : i32, i32
  }
  func.func @transform_4(%arg0: i32, %arg1: i32) -> (i32, i32) {
    %c0_i32 = arith.constant 0 : i32
    %c0_i32_0 = arith.constant 0 : i32
    %c0_i32_1 = arith.constant 0 : i32
    return %c0_i32, %c0_i32_0 : i32, i32
  }
  func.func @transform_5(%arg0: i32, %arg1: i32) -> (i32, i32) {
    %c0_i32 = arith.constant 0 : i32
    %c0_i32_0 = arith.constant 0 : i32
    return %arg0, %c0_i32 : i32, i32
  }
}

</mosaic_0001>

<bundles_post_ra>
// kernel: policy_forward.1
= control target key start
LH: loop header
LB: loop body
LE: loop exit
PB: predicated region body
PF: predicated region fallthrough
CT: control target
= control target key end

     0   :  { %vm1144_vm0 = vmmov 0   ;;  %s1412_s1 = inlined_call_operand.vmem [shape: bf16[1024,128], index: 1, kind: input, shape index: {}]   ;;  %s1413_s0 = inlined_call_operand.vmem [shape: bf16[8,1024], index: 0, kind: input, shape index: {}]   ;;  %s1414_s3 = inlined_call_operand.vmem [shape: bf16[128,128], index: 3, kind: input, shape index: {}]   ;;  %s1415_s2 = inlined_call_operand.vmem [shape: f32[1,128], index: 2, kind: input, shape index: {}]   ;;  %s1416_s4 = inlined_call_operand.vmem [shape: f32[1,128], index: 4, kind: input, shape index: {}]   ;;  %s1417_s5 = inlined_call_operand.vmem [shape: f32[8,128], index: 5, kind: output, shape index: {}]  }
   0x1   :  { %v1063_v0 = vld [vmem:[%s1412_s1 + $0x78] sm:$0xff]   ;;  %v1067_v4 = vld [vmem:[%s1412_s1 + $0x70] sm:$0xff]   ;;  %v1071_v8 = vld [vmem:[%s1412_s1 + $0x68] sm:$0xff]  }
   0x2   :  { %v1064_v1 = vld [vmem:[%s1412_s1 + $0xf8] sm:$0xff]   ;;  %944 = vmatprep.subr.bf16.mxu0 %v1063_v0  ;;  %v1068_v5 = vld [vmem:[%s1412_s1 + $0xf0] sm:$0xff]   ;;  %v1072_v9 = vld [vmem:[%s1412_s1 + $0xe8] sm:$0xff]  }
   0x3   :  { %v1065_v2 = vld [vmem:[%s1412_s1 + $0x38] sm:$0xff]   ;;  %966 = vmatprep.subr.bf16.mxu1 %v1064_v1  ;;  %v1069_v6 = vld [vmem:[%s1412_s1 + $0x30] sm:$0xff]   ;;  %v1073_v10 = vld [vmem:[%s1412_s1 + $0x28] sm:$0xff]  }
   0x4   :  { %v1066_v3 = vld [vmem:[%s1412_s1 + $0xb8] sm:$0xff]   ;;  %945 = vmatpush3.bf16.msra.mxu0 %v1065_v2  ;;  %v1070_v7 = vld [vmem:[%s1412_s1 + $0xb0] sm:$0xff]   ;;  %v1074_v11 = vld [vmem:[%s1412_s1 + $0xa8] sm:$0xff]  }
   0x5   :  { %967 = vmatpush3.bf16.msra.mxu1 %v1066_v3  ;;  %946 = vmatprep.subr.bf16.mxu0 %v1067_v4  ;;  %v1075_v12 = vld [vmem:[%s1412_s1 + $0x60] sm:$0xff]   ;;  %v1079_v16 = vld [vmem:[%s1412_s1 + $0x58] sm:$0xff]   ;;  %v1083_v20 = vld [vmem:[%s1412_s1 + $0x50] sm:$0xff]  }
   0x6   :  { %968 = vmatprep.subr.bf16.mxu1 %v1068_v5  ;;  %v1076_v13 = vld [vmem:[%s1412_s1 + $0xe0] sm:$0xff]   ;;  %v1080_v17 = vld [vmem:[%s1412_s1 + $0xd8] sm:$0xff]   ;;  %v1084_v21 = vld [vmem:[%s1412_s1 + $0xd0] sm:$0xff]  }
   0x7   :  { %v1077_v14 = vld [vmem:[%s1412_s1 + $0x20] sm:$0xff]   ;;  %v1081_v18 = vld [vmem:[%s1412_s1 + $0x18] sm:$0xff]   ;;  %v1085_v22 = vld [vmem:[%s1412_s1 + $0x10] sm:$0xff]  }
   0x8   :  { %947 = vmatpush3.bf16.msra.mxu0 %v1069_v6  ;;  %v1078_v15 = vld [vmem:[%s1412_s1 + $0xa0] sm:$0xff]   ;;  %v1082_v19 = vld [vmem:[%s1412_s1 + $0x98] sm:$0xff]   ;;  %v1086_v23 = vld [vmem:[%s1412_s1 + $0x90] sm:$0xff]  }
   0x9   :  { %969 = vmatpush3.bf16.msra.mxu1 %v1070_v7  ;;  %948 = vmatprep.subr.bf16.mxu0 %v1071_v8  ;;  %v1087_v24 = vld [vmem:[%s1412_s1 + $0x48] sm:$0xff]   ;;  %v1091_v28 = vld [vmem:[%s1412_s1 + $0x40] sm:$0xff]   ;;  %v1099_v38 = vld [vmem:[%s1412_s1 + $0x178] sm:$0xff]  }
   0xa   :  { %970 = vmatprep.subr.bf16.mxu1 %v1072_v9  ;;  %v1088_v25 = vld [vmem:[%s1412_s1 + $0xc8] sm:$0xff]   ;;  %v1092_v29 = vld [vmem:[%s1412_s1 + $0xc0] sm:$0xff]   ;;  %v1100_v39 = vld [vmem:[%s1412_s1 + $0x1f8] sm:$0xff]  }
   0xb   :  { %v1089_v26 = vld [vmem:[%s1412_s1 + $0x8] sm:$0xff]   ;;  %v1093_v30 = vld [vmem:[%s1412_s1] sm:$0xff]   ;;  %v1101_v40 = vld [vmem:[%s1412_s1 + $0x138] sm:$0xff]  }
   0xc   :  { %949 = vmatpush3.bf16.msra.mxu0 %v1073_v10  ;;  %v1090_v27 = vld [vmem:[%s1412_s1 + $0x88] sm:$0xff]   ;;  %v1094_v31 = vld [vmem:[%s1412_s1 + $0x80] sm:$0xff]   ;;  %v1102_v41 = vld [vmem:[%s1412_s1 + $0x1b8] sm:$0xff]  }
   0xd   :  { %971 = vmatpush3.bf16.msra.mxu1 %v1074_v11  ;;  %950 = vmatprep.subr.bf16.mxu0 %v1075_v12  ;;  %v27_v32 = vld [vmem:[%s1413_s0] sm:$0xff]  ;;  %v28_v33 = vld [vmem:[%s1413_s0 + $0x8] sm:$0xff]  ;;  %v1103_v42 = vld [vmem:[%s1412_s1 + $0x170] sm:$0xff]   ;;  %v1143_v12 = vmov 0.0  }
   0xe   :  { %972 = vmatprep.subr.bf16.mxu1 %v1076_v13  ;;  %v862_v34 = vcombine.low %v27_v32, %v27_v32  ;;  %v863_v35 = vcombine.high %v27_v32, %v27_v32  ;;  %v864_v36 = vcombine.low %v28_v33, %v28_v33  ;;  %v865_v37 = vcombine.high %v28_v33, %v28_v33  ;;  %v1104_v43 = vld [vmem:[%s1412_s1 + $0x1f0] sm:$0xff]   ;;  %v1107_v46 = vld [vmem:[%s1412_s1 + $0x168] sm:$0xff]   ;;  %v1111_v50 = vld [vmem:[%s1412_s1 + $0x160] sm:$0xff]  }
   0xf   :  { %v1105_v44 = vld [vmem:[%s1412_s1 + $0x130] sm:$0xff]   ;;  %v1108_v47 = vld [vmem:[%s1412_s1 + $0x1e8] sm:$0xff]   ;;  %v1112_v51 = vld [vmem:[%s1412_s1 + $0x1e0] sm:$0xff]  }
  0x10   :  { %951 = vmatpush3.bf16.msra.mxu0 %v1077_v14  ;;  %603 = vmatprep.mubr.bf16.mxu0 %v863_v35  ;;  %v1106_v45 = vld [vmem:[%s1412_s1 + $0x1b0] sm:$0xff]   ;;  %v1109_v48 = vld [vmem:[%s1412_s1 + $0x128] sm:$0xff]   ;;  %v1113_v52 = vld [vmem:[%s1412_s1 + $0x120] sm:$0xff]  }
  0x11   :  { %973 = vmatpush3.bf16.msra.mxu1 %v1078_v15  ;;  %952 = vmatprep.subr.bf16.mxu0 %v1079_v16  ;;  %v1110_v49 = vld [vmem:[%s1412_s1 + $0x1a8] sm:$0xff]   ;;  %v1114_v53 = vld [vmem:[%s1412_s1 + $0x1a0] sm:$0xff]   ;;  %v1115_v54 = vld [vmem:[%s1412_s1 + $0x158] sm:$0xff]  }
  0x12   :  { %974 = vmatprep.subr.bf16.mxu1 %v1080_v17  ;;  %643 = vmatprep.mubr.bf16.mxu1 %v865_v37  ;;  %v1116_v55 = vld [vmem:[%s1412_s1 + $0x1d8] sm:$0xff]   ;;  %v1119_v58 = vld [vmem:[%s1412_s1 + $0x150] sm:$0xff]   ;;  %v1123_v62 = vld [vmem:[%s1412_s1 + $0x148] sm:$0xff]  }
  0x13   :  { %v1117_v56 = vld [vmem:[%s1412_s1 + $0x118] sm:$0xff]   ;;  %v1120_v59 = vld [vmem:[%s1412_s1 + $0x1d0] sm:$0xff]   ;;  %v1124_v63 = vld [vmem:[%s1412_s1 + $0x1c8] sm:$0xff]  }
  0x14   :  { %953 = vmatpush3.bf16.msra.mxu0 %v1081_v18  ;;  %v1118_v57 = vld [vmem:[%s1412_s1 + $0x198] sm:$0xff]   ;;  %v1121_v60 = vld [vmem:[%s1412_s1 + $0x110] sm:$0xff]   ;;  %v1125_v0 = vld [vmem:[%s1412_s1 + $0x108] sm:$0xff]  }
  0x15   :  { %975 = vmatpush3.bf16.msra.mxu1 %v1082_v19  ;;  %954 = vmatprep.subr.bf16.mxu0 %v1083_v20  ;;  %v1122_v61 = vld [vmem:[%s1412_s1 + $0x190] sm:$0xff]   ;;  %v1126_v1 = vld [vmem:[%s1412_s1 + $0x188] sm:$0xff]   ;;  %v1127_v2 = vld [vmem:[%s1412_s1 + $0x140] sm:$0xff]  }
  0x16   :  { %976 = vmatprep.subr.bf16.mxu1 %v1084_v21  ;;  %v1128_v3 = vld [vmem:[%s1412_s1 + $0x1c0] sm:$0xff]   ;;  %v29_v6 = vld [vmem:[%s1413_s0 + $0x10] sm:$0xff]  ;;  %v30_v9 = vld [vmem:[%s1413_s0 + $0x18] sm:$0xff] }
  0x17   :  { %v1129_v4 = vld [vmem:[%s1412_s1 + $0x100] sm:$0xff]   ;;  %v866_v7 = vcombine.low %v29_v6, %v29_v6  ;;  %v867_v8 = vcombine.high %v29_v6, %v29_v6  ;;  %v868_v10 = vcombine.low %v30_v9, %v30_v9  ;;  %v869_v11 = vcombine.high %v30_v9, %v30_v9  ;;  %v1135_v13 = vld [vmem:[%s1414_s3 + $0x38] sm:$0xff]   ;;  %v1136_v14 = vld [vmem:[%s1414_s3 + $0x30] sm:$0xff]  }
  0x18   :  { %955 = vmatpush3.bf16.msra.mxu0 %v1085_v22  ;;  %v1130_v5 = vld [vmem:[%s1412_s1 + $0x180] sm:$0xff]   ;;  %v1137_v15 = vld [vmem:[%s1414_s3 + $0x28] sm:$0xff]   ;;  %v1139_v17 = vld [vmem:[%s1414_s3 + $0x18] sm:$0xff]  }
  0x19   :  { %977 = vmatpush3.bf16.msra.mxu1 %v1086_v23  ;;  %956 = vmatprep.subr.bf16.mxu0 %v1087_v24  ;;  %v1138_v16 = vld [vmem:[%s1414_s3 + $0x20] sm:$0xff]   ;;  %v1140_v18 = vld [vmem:[%s1414_s3 + $0x10] sm:$0xff]   ;;  %v1141_v19 = vld [vmem:[%s1414_s3 + $0x8] sm:$0xff]  }
  0x1a   :  { %978 = vmatprep.subr.bf16.mxu1 %v1088_v25  ;;  %v1142_v20 = vld [vmem:[%s1414_s3] sm:$0xff]  }
  0x1c   :  { %957 = vmatpush3.bf16.msra.mxu0 %v1089_v26 }
  0x1d   :  { %979 = vmatpush3.bf16.msra.mxu1 %v1090_v27  ;;  %958 = vmatprep.subr.bf16.mxu0 %v1091_v28 }
  0x1e   :  { %980 = vmatprep.subr.bf16.mxu1 %v1092_v29 }
  0x20   :  { %959 = vmatpush3.bf16.msra.mxu0 %v1093_v30 }
  0x21   :  { %981 = vmatpush3.bf16.msra.mxu1 %v1094_v31  ;;  %988 = vmatprep.subr.bf16.mxu0 %v1099_v38 }
  0x22   :  { %1010 = vmatprep.subr.bf16.mxu1 %v1100_v39 }
  0x23   :  { %604 = vmatmul.mubr.bf16.vlgmr.msra.gmra.mxu0 %v862_v34 }
  0x24   :  { %644 = vmatmul.mubr.bf16.vlgmr.msra.gmra.mxu1 %v864_v36  ;;  %989 = vmatpush3.bf16.msra.mxu0 %v1101_v40 }
  0x25   :  { %1011 = vmatpush3.bf16.msra.mxu1 %v1102_v41  ;;  %990 = vmatprep.subr.bf16.mxu0 %v1103_v42  ;;  %v934_v41 = vld [vmem:[%s1415_s2] ss:$0 sm:$0xff] }
  0x26   :  { %1012 = vmatprep.subr.bf16.mxu1 %v1104_v43  ;;  %683 = vmatprep.mubr.bf16.mxu0 %v867_v8 }
  0x27   :  { %723 = vmatprep.mubr.bf16.mxu1 %v869_v11 }
  0x28   :  { %991 = vmatpush3.bf16.msra.mxu0 %v1105_v44 }
  0x29   :  { %1013 = vmatpush3.bf16.msra.mxu1 %v1106_v45  ;;  %992 = vmatprep.subr.bf16.mxu0 %v1107_v46 }
  0x2a   :  { %1014 = vmatprep.subr.bf16.mxu1 %v1108_v47  ;;  %v935_v47 = vld [vmem:[%s1416_s4] ss:$0 sm:$0xff] }
  0x2c   :  { %993 = vmatpush3.bf16.msra.mxu0 %v1109_v48 }
  0x2d   :  { %1015 = vmatpush3.bf16.msra.mxu1 %v1110_v49  ;;  %994 = vmatprep.subr.bf16.mxu0 %v1111_v50 }
  0x2e   :  { %1016 = vmatprep.subr.bf16.mxu1 %v1112_v51 }
  0x30   :  { %995 = vmatpush3.bf16.msra.mxu0 %v1113_v52 }
  0x31   :  { %1017 = vmatpush3.bf16.msra.mxu1 %v1114_v53  ;;  %996 = vmatprep.subr.bf16.mxu0 %v1115_v54 }
  0x32   :  { %1018 = vmatprep.subr.bf16.mxu1 %v1116_v55 }
  0x34   :  { %997 = vmatpush3.bf16.msra.mxu0 %v1117_v56 }
  0x35   :  { %1019 = vmatpush3.bf16.msra.mxu1 %v1118_v57  ;;  %998 = vmatprep.subr.bf16.mxu0 %v1119_v58 }
  0x36   :  { %1020 = vmatprep.subr.bf16.mxu1 %v1120_v59 }
  0x38   :  { %999 = vmatpush3.bf16.msra.mxu0 %v1121_v60 }
  0x39   :  { %1021 = vmatpush3.bf16.msra.mxu1 %v1122_v61  ;;  %1000 = vmatprep.subr.bf16.mxu0 %v1123_v62 }
  0x3a   :  { %1022 = vmatprep.subr.bf16.mxu1 %v1124_v63 }
  0x3c   :  { %1001 = vmatpush3.bf16.msra.mxu0 %v1125_v0 }
  0x3d   :  { %1023 = vmatpush3.bf16.msra.mxu1 %v1126_v1  ;;  %1002 = vmatprep.subr.bf16.mxu0 %v1127_v2 }
  0x3e   :  { %1024 = vmatprep.subr.bf16.mxu1 %v1128_v3 }
  0x40   :  { %1003 = vmatpush3.bf16.msra.mxu0 %v1129_v4 }
  0x41   :  { %1025 = vmatpush3.bf16.msra.mxu1 %v1130_v5  ;;  %1041 = vmatprep.subr.bf16.mxu0 %v1143_v12 }
  0x43   :  { %684 = vmatmul.mubr.bf16.vlgmr.msra.gmra.mxu0 %v866_v7 }
  0x44   :  { %724 = vmatmul.mubr.bf16.vlgmr.msra.gmra.mxu1 %v868_v10  ;;  %1042 = vmatpush3.bf16.msra.mxu0 %v1135_v13 }
  0x45   :  { %1043 = vmatprep.subr.bf16.mxu0 %v1143_v12  ;;  %1057 = vmatprep.mubr.msk.bf16.mxu0 %vm1144_vm0, %v1143_v12 }
  0x48   :  { %1044 = vmatpush3.bf16.msra.mxu0 %v1136_v14 }
  0x49   :  { %1045 = vmatprep.subr.bf16.mxu0 %v1143_v12 }
  0x4c   :  { %1046 = vmatpush3.bf16.msra.mxu0 %v1137_v15 }
  0x4d   :  { %1047 = vmatprep.subr.bf16.mxu0 %v1143_v12 }
  0x50   :  { %1048 = vmatpush3.bf16.msra.mxu0 %v1138_v16 }
  0x51   :  { %1049 = vmatprep.subr.bf16.mxu0 %v1143_v12 }
  0x54   :  { %1050 = vmatpush3.bf16.msra.mxu0 %v1139_v17 }
  0x55   :  { %1051 = vmatprep.subr.bf16.mxu0 %v1143_v12 }
  0x58   :  { %1052 = vmatpush3.bf16.msra.mxu0 %v1140_v18 }
  0x59   :  { %1053 = vmatprep.subr.bf16.mxu0 %v1143_v12 }
  0x5c   :  { %1054 = vmatpush3.bf16.msra.mxu0 %v1141_v19 }
  0x5d   :  { %1055 = vmatprep.subr.bf16.mxu0 %v1143_v12 }
  0x60   :  { %1056 = vmatpush3.bf16.msra.mxu0 %v1142_v20 }
  0xe3   :  { %v960_v21 = vpop.f32.mrf.mxu0 }
  0xe4   :  { %v982_v22 = vpop.f32.mrf.mxu1 }
  0xe5   :  { %v961_v23 = vpop.f32.mrf.mxu0 }
  0xe6   :  { %v983_v24 = vpop.f32.mrf.mxu1  ;;  %v962_v29 = vadd.f32 %v961_v23, %v960_v21 }
  0xe7   :  { %v963_v25 = vpop.f32.mrf.mxu0  ;;  %v984_v30 = vadd.f32 %v983_v24, %v982_v22 }
  0xe8   :  { %v985_v26 = vpop.f32.mrf.mxu1 }
  0xe9   :  { %v964_v27 = vpop.f32.mrf.mxu0  ;;  %v646_v35 = vadd.f32 %v984_v30, %v962_v29 }
  0xea   :  { %v986_v28 = vpop.f32.mrf.mxu1 }
 0x103   :  { %v1004_v31 = vpop.f32.mrf.mxu0 }
 0x104   :  { %v1026_v32 = vpop.f32.mrf.mxu1 }
 0x105   :  { %v1005_v33 = vpop.f32.mrf.mxu0 }
 0x106   :  { %v1027_v34 = vpop.f32.mrf.mxu1  ;;  %v1006_v36 = vadd.f32 %v1005_v33, %v1004_v31 }
 0x107   :  { %v1007_v37 = vpop.f32.mrf.mxu0  ;;  %v1028_v40 = vadd.f32 %v1027_v34, %v1026_v32 }
 0x108   :  { %v1029_v38 = vpop.f32.mrf.mxu1  ;;  %v686_v39 = vadd.f32 %v1006_v36, %v646_v35 }
 0x109   :  { %v1008_v42 = vpop.f32.mrf.mxu0 }
 0x10a   :  { %v1030_v43 = vpop.f32.mrf.mxu1  ;;  %v726_v44 = vadd.f32 %v1028_v40, %v686_v39 }
 0x10c   :  { %v744_v45 = vadd.f32 %v934_v41, %v726_v44 }
 0x10e   :  { %v745_v46 = vpack.c.bf16 %v744_v45, %v744_v45 }
 0x110   :  { %1058 = vmatmul.mubr.bf16.vlgmr.msra.gmra.mxu0 %v745_v46 }
 0x1d0   :  { %v851_v48 = vpop.f32.mrf.mxu0 }
 0x1d1   :  { %v852_v49 = vadd.f32 %v935_v47, %v851_v48 }
 0x1d2   :  { %v1059_v50 = vpop.f32.mrf.mxu0 }
 0x1d3   :  { %857 = vst [vmem:[%s1417_s5] sm:$0xff] %v852_v49 }
 0x1d4   :  { %v854_v51 = vpop.f32.mrf.mxu0 }
 0x1d6   :  { %v1060_v52 = vpop.f32.mrf.mxu0 }

</bundles_post_ra>
